<compile_context>
chip_gen: v7x
topology: tpu7x:2x2x1
jax: 0.10.0
libtpu: 0.0.40
codegen_flags: <defaults>
</compile_context>

<pallas_src>
import functools

import jax
import jax.numpy as jnp
from jax.experimental import pallas as pl
from jax.experimental.pallas import tpu as pltpu


def _moving_avg_kernel(x_ref, o_ref, *scratch, kernel_size, stride, pad_left, chunk):
    # x_ref: (L, TC) input block (one batch element, one channel tile).
    # o_ref: (Lo, TC) output block.
    # scratch: () for stride == 1, (ma_ref,) with shape (L, TC) f32 for stride > 1.
    L, TC = x_ref.shape
    Lo = o_ref.shape[0]
    K = kernel_size
    inv_k = 1.0 / K

    # Edge rows used for the fused replicate padding (loaded once).
    ef = x_ref[0:1, :].astype(jnp.float32)        # row 0   -> left padding value
    el = x_ref[L - 1:L, :].astype(jnp.float32)    # row L-1 -> right padding value

    if stride == 1:
        def store(j0, rows, acc):
            o_ref[pl.ds(j0, rows), :] = (acc * inv_k).astype(o_ref.dtype)
    else:
        ma_ref, = scratch
        def store(j0, rows, acc):
            ma_ref[pl.ds(j0, rows), :] = acc

    # Stride-1 moving sums are computed at every position p in [0, L) in small
    # chunks so the accumulator stays in vregs; for stride > 1 they are written
    # to VMEM scratch and downsampled once at the end.
    for j0 in range(0, L, chunk):
        rows = min(chunk, L - j0)
        acc = jnp.zeros((rows, TC), jnp.float32)
        for k in range(K):
            # Source row for local row r is start + r; everything here is static.
            start = j0 + k - pad_left
            n_lo = min(rows, max(0, -start))                     # rows clamped to x[0]
            n_hi = min(rows - n_lo, max(0, start + rows - L))    # rows clamped to x[L-1]
            n_mid = rows - n_lo - n_hi
            pieces = []
            if n_lo > 0:
                pieces.append(jnp.broadcast_to(ef, (n_lo, TC)))
            if n_mid > 0:
                pieces.append(x_ref[pl.ds(start + n_lo, n_mid), :].astype(jnp.float32))
            if n_hi > 0:
                pieces.append(jnp.broadcast_to(el, (n_hi, TC)))
            seg = pieces[0] if len(pieces) == 1 else jnp.concatenate(pieces, axis=0)
            acc = acc + seg
        store(j0, rows, acc)

    if stride > 1:
        ma_ref, = scratch
        # Single strided downsample: one strided sublane read instead of K.
        # TODO(synk): if Mosaic rejects this sublane stride for exotic values,
        # fall back to per-row copies.
        o_ref[...] = (ma_ref[pl.ds(0, Lo, stride=stride), :] * inv_k).astype(o_ref.dtype)


def moving_avg(x, kernel_size, stride=1):
    """x: (B, L, C) -> (B, Lo, C); replicate-pad by K-1 rows then AvgPool1d(K, stride)."""
    B, L, C = x.shape
    K = int(kernel_size)
    stride = int(stride)
    pad_total = K - 1
    pad_left = pad_total // 2           # matches the given PyTorch module exactly
    Lo = (L + pad_total - K) // stride + 1   # == (L - 1)//stride + 1

    TC = min(C, 128)                    # lane-dense channel tile
    num_c = pl.cdiv(C, TC)
    chunk = 32                          # acc = (<=32, <=128) f32 -> register-resident

    scratch_shapes = [] if stride == 1 else [pltpu.VMEM((L, TC), jnp.float32)]

    kernel = functools.partial(
        _moving_avg_kernel,
        kernel_size=K, stride=stride, pad_left=pad_left, chunk=chunk,
    )
    return pl.pallas_call(
        kernel,
        out_shape=jax.ShapeDtypeStruct((B, Lo, C), x.dtype),
        grid=(B, num_c),
        in_specs=[pl.BlockSpec((None, L, TC), lambda b, c: (b, 0, c))],
        out_specs=pl.BlockSpec((None, Lo, TC), lambda b, c: (b, 0, c)),
        scratch_shapes=scratch_shapes,
        compiler_params=pltpu.CompilerParams(
            dimension_semantics=("parallel", "parallel"),
            vmem_limit_bytes=32 * 1024 * 1024,
        ),
    )(x)


def _reference(x, kernel_size, stride=1):
    pad_total = kernel_size - 1
    pad_left = pad_total // 2
    pad_right = pad_total - pad_left
    front = jnp.repeat(x[:, 0:1, :], pad_left, axis=1)
    end = jnp.repeat(x[:, -1:, :], pad_right, axis=1)
    xp = jnp.concatenate([front, x, end], axis=1)
    Lp = xp.shape[1]
    Lo = (Lp - kernel_size) // stride + 1
    outs = [
        jnp.mean(xp[:, t * stride: t * stride + kernel_size, :], axis=1)
        for t in range(Lo)
    ]
    return jnp.stack(outs, axis=1)


if __name__ == "__main__":
    key = jax.random.PRNGKey(0)

    # Config 1: tiny shapes matching the module's typical use (K=5, stride=1).
    k1, k2 = jax.random.split(key)
    x_small = jax.random.normal(k1, (2, 16, 8), dtype=jnp.float32)
    out_small = jax.block_until_ready(moving_avg(x_small, kernel_size=5, stride=1))
    ref_small = _reference(x_small, 5, 1)
    assert out_small.shape == ref_small.shape, (out_small.shape, ref_small.shape)
    assert jnp.allclose(out_small, ref_small, atol=1e-5, rtol=1e-5), "mismatch (small)"

    # Config 2: larger kernel + lane-dense channel tiling (two 128-wide C tiles).
    x_big = jax.random.normal(k2, (2, 96, 256), dtype=jnp.float32)
    out_big = jax.block_until_ready(moving_avg(x_big, kernel_size=25, stride=1))
    ref_big = _reference(x_big, 25, 1)
    assert out_big.shape == ref_big.shape, (out_big.shape, ref_big.shape)
    assert jnp.allclose(out_big, ref_big, atol=1e-4, rtol=1e-4), "mismatch (big)"

    print("KERNEL_OK")
</pallas_src>

<mosaic_0001>
module attributes {stable_mosaic.version = 11 : i64} {
  func.func @_moving_avg_kernel(%arg0: i32, %arg1: i32, %arg2: memref<1x16x8xf32, #tpu.memory_space<vmem>>, %arg3: memref<1x16x8xf32, #tpu.memory_space<vmem>>) attributes {dimension_semantics = [#tpu.dimension_semantics<parallel>, #tpu.dimension_semantics<parallel>], iteration_bounds = array<i64: 2, 1>, scalar_prefetch = 0 : i64, scratch_operands = 0 : i64, tpu.core_type = #tpu.core_type<tc>, window_params = [{transform_indices = @transform_0, window_bounds = array<i64: 1, 16, 8>}, {transform_indices = @transform_1, window_bounds = array<i64: 1, 16, 8>}]} {
    %c0 = arith.constant 0 : index
    %c0_0 = arith.constant 0 : index
    %c0_1 = arith.constant 0 : index
    %0 = vector.load %arg2[%c0, %c0_0, %c0_1] : memref<1x16x8xf32, #tpu.memory_space<vmem>>, vector<1x1x8xf32>
    %1 = vector.shape_cast %0 : vector<1x1x8xf32> to vector<1x8xf32>
    %c0_2 = arith.constant 0 : index
    %c15 = arith.constant 15 : index
    %c0_3 = arith.constant 0 : index
    %2 = vector.load %arg2[%c0_2, %c15, %c0_3] : memref<1x16x8xf32, #tpu.memory_space<vmem>>, vector<1x1x8xf32>
    %3 = vector.shape_cast %2 : vector<1x1x8xf32> to vector<1x8xf32>
    %cst = arith.constant 0.000000e+00 : f32
    %4 = vector.broadcast %cst : f32 to vector<16x8xf32>
    %5 = vector.shape_cast %1 : vector<1x8xf32> to vector<1x8xf32>
    %6 = vector.broadcast %5 : vector<1x8xf32> to vector<2x8xf32>
    %c0_4 = arith.constant 0 : index
    %c0_5 = arith.constant 0 : index
    %c0_6 = arith.constant 0 : index
    %7 = vector.load %arg2[%c0_4, %c0_5, %c0_6] : memref<1x16x8xf32, #tpu.memory_space<vmem>>, vector<1x14x8xf32>
    %8 = vector.shape_cast %7 : vector<1x14x8xf32> to vector<14x8xf32>
    %9 = tpu.concatenate %6, %8 in 0 : vector<2x8xf32>, vector<14x8xf32> -> vector<16x8xf32>
    %10 = arith.addf %4, %9 : vector<16x8xf32>
    %c0_7 = arith.constant 0 : index
    %c0_8 = arith.constant 0 : index
    %c0_9 = arith.constant 0 : index
    %11 = vector.load %arg2[%c0_7, %c0_8, %c0_9] : memref<1x16x8xf32, #tpu.memory_space<vmem>>, vector<1x15x8xf32>
    %12 = vector.shape_cast %11 : vector<1x15x8xf32> to vector<15x8xf32>
    %13 = tpu.concatenate %1, %12 in 0 : vector<1x8xf32>, vector<15x8xf32> -> vector<16x8xf32>
    %14 = arith.addf %10, %13 : vector<16x8xf32>
    %c0_10 = arith.constant 0 : index
    %c0_11 = arith.constant 0 : index
    %c0_12 = arith.constant 0 : index
    %15 = vector.load %arg2[%c0_10, %c0_11, %c0_12] : memref<1x16x8xf32, #tpu.memory_space<vmem>>, vector<1x16x8xf32>
    %16 = vector.shape_cast %15 : vector<1x16x8xf32> to vector<16x8xf32>
    %17 = arith.addf %14, %16 : vector<16x8xf32>
    %c0_13 = arith.constant 0 : index
    %c1 = arith.constant 1 : index
    %c0_14 = arith.constant 0 : index
    %18 = vector.load %arg2[%c0_13, %c1, %c0_14] : memref<1x16x8xf32, #tpu.memory_space<vmem>>, vector<1x15x8xf32>
    %19 = vector.shape_cast %18 : vector<1x15x8xf32> to vector<15x8xf32>
    %20 = tpu.concatenate %19, %3 in 0 : vector<15x8xf32>, vector<1x8xf32> -> vector<16x8xf32>
    %21 = arith.addf %17, %20 : vector<16x8xf32>
    %c0_15 = arith.constant 0 : index
    %c2 = arith.constant 2 : index
    %c0_16 = arith.constant 0 : index
    %22 = vector.load %arg2[%c0_15, %c2, %c0_16] : memref<1x16x8xf32, #tpu.memory_space<vmem>>, vector<1x14x8xf32>
    %23 = vector.shape_cast %22 : vector<1x14x8xf32> to vector<14x8xf32>
    %24 = vector.shape_cast %3 : vector<1x8xf32> to vector<1x8xf32>
    %25 = vector.broadcast %24 : vector<1x8xf32> to vector<2x8xf32>
    %26 = tpu.concatenate %23, %25 in 0 : vector<14x8xf32>, vector<2x8xf32> -> vector<16x8xf32>
    %27 = arith.addf %21, %26 : vector<16x8xf32>
    %cst_17 = arith.constant 2.000000e-01 : f32
    %28 = vector.broadcast %cst_17 : f32 to vector<16x8xf32>
    %29 = arith.mulf %27, %28 : vector<16x8xf32>
    %c0_18 = arith.constant 0 : index
    %c0_19 = arith.constant 0 : index
    %c0_20 = arith.constant 0 : index
    %30 = vector.load %arg3[%c0_18, %c0_19, %c0_20] : memref<1x16x8xf32, #tpu.memory_space<vmem>>, vector<1x16x8xf32>
    %31 = vector.shape_cast %30 : vector<1x16x8xf32> to vector<16x8xf32>
    %32 = vector.shape_cast %29 : vector<16x8xf32> to vector<1x16x8xf32>
    tpu.vector_store %arg3[%c0_18, %c0_19, %c0_20], %32 {strides = array<i32>} : memref<1x16x8xf32, #tpu.memory_space<vmem>>, vector<1x16x8xf32>,
    return
  }
  func.func @transform_0(%arg0: i32, %arg1: i32) -> (i32, i32, i32) {
    %c0_i32 = arith.constant 0 : i32
    %c0_i32_0 = arith.constant 0 : i32
    return %arg0, %c0_i32, %arg1 : i32, i32, i32
  }
  func.func @transform_1(%arg0: i32, %arg1: i32) -> (i32, i32, i32) {
    %c0_i32 = arith.constant 0 : i32
    %c0_i32_0 = arith.constant 0 : i32
    return %arg0, %c0_i32, %arg1 : i32, i32, i32
  }
}

</mosaic_0001>

<bundles_post_ra>
// kernel: tpu_custom_call.1
= control target key start
LH: loop header
LB: loop body
LE: loop exit
PB: predicated region body
PF: predicated region fallthrough
CT: control target
= control target key end

     0   :  { %s359_s6 = smov 0   ;;  %s361_s7 = smov 0   ;;  %s403_s0 = inlined_call_operand.vmem [shape: f32[2,16,8], index: 0, kind: input, shape index: {}]   ;;  %s404_s1 = inlined_call_operand.vmem [shape: f32[2,16,8], index: 1, kind: output, shape index: {}]  }
   0x1   :  { %s363_s8 = smov 0  }
   0x2 LB: > { %s23_s9 = sadd.s32 1, %s343_s7  ;;  %p292_p0 = scmp.ge.s32.totalorder %s347_s8, 1  ;;  %s347_s8 = sphi %s363_s8, %s11_s8   ;;  %s343_s7 = sphi %s361_s7, %s406_s7   ;;  %s339_s6 = sphi %s359_s6, %s405_s6  }
   0x3   : > { %p25_p1 = scmp.ge.s32.totalorder %s23_s9, 2  ;;  %p106_p2 = scmp.lt.s32.totalorder %s347_s8, 3 }
   0x5   : > { %s408_s9 = smov (%p25_p1, %s23_s9), 0  ;;  %p107_p3 = pnand %p292_p0, %p106_p2 }
   0x6   : > { %p132_p4 = scmp.lt.s32.totalorder (!%p107_p3), %s339_s6, 1  ;;  %v150_v0 = vlaneseq (!%p107_p3)  ;;  %vm158_vm0 = vcmask (!%p107_p3), 1041408   ;;  %vm169_vm1 = vcmask (!%p107_p3), 1040384   ;;  %vm186_vm2 = vcmask (!%p107_p3), 1046528  }
   0x7   : > { %110 = sbr.rel (%p107_p3) target bundleno = 33 (0x21), region = 24  ;;  %vm196_vm3 = vcmask (!%p107_p3), 1045504   ;;  %vm202_vm4 = vcmask (!%p107_p3), 64512  }
   0x8   : > { %v151_v1 = vshrl.u32 (!%p107_p3), %v150_v0, 7 }
   0xa   : > { %v152_v2 = vsub.s32 (!%p107_p3), 0, %v151_v1 }
   0xe   : > { %s410_s6 = smov (!%p132_p4, %s339_s6), 1 }
   0xf   : > { %s299_s10 = sshll.u32 %s410_s6, 4 }
  0x10   : > { %s139_s13 = scalar_lea.vmem %s403_s0, %s299_s10  ;;  %s147_s16 = scalar_lea.vmem %s404_s1, %s299_s10 }
  0x11   : > { %v148_v3 = vld [vmem:[%s139_s13] sm:$0x1]  ;;  %v149_v8 = vld [vmem:[%s139_s13 + $0xf] sm:$0x1]  ;;  %v155_v9 = vld [vmem:[%s139_s13 + $0x8] sm:$0x3f] }
  0x12   : > { %v154_v4 = vld [vmem:[%s139_s13] sm:$0xff]  ;;  %v153_v5 = vrot.slane %v148_v3, %v152_v2  ;;  %v167_v10 = vld [vmem:[%s139_s13 + $0x8] sm:$0x7f]  ;;  %v160_v13 = vrot.slane %v155_v9, 6  ;;  %v184_v17 = vrot.slane %v149_v8, 1  ;;  %v195_v22 = vrot.slane %v149_v8, %v152_v2 }
  0x13   : > { %v159_v6 = vrot.slane %v154_v4, 6  ;;  %v170_v7 = vrot.slane %v154_v4, 7  ;;  %v171_v14 = vrot.slane %v167_v10, 7  ;;  %v182_v16 = vld [vmem:[%s139_s13 + $0x9] sm:$0x7f]  ;;  %v181_v18 = vld [vmem:[%s139_s13 + $0x1] sm:$0xff] }
  0x14   : > { %v178_v21 = vld [vmem:[%s139_s13 + $0x8] sm:$0xff]  ;;  %v187_v27 = vsel %vm186_vm2, %v182_v16, %v184_v17 }
  0x15   : > { %v164_v11 = vsel %vm158_vm0, %v153_v5, %v159_v6  ;;  %v175_v12 = vsel %vm169_vm1, %v148_v3, %v170_v7  ;;  %v161_v19 = vsel %vm158_vm0, %v159_v6, %v160_v13  ;;  %v172_v20 = vsel %vm169_vm1, %v170_v7, %v171_v14  ;;  %v191_v25 = vld [vmem:[%s139_s13 + $0xa] sm:$0x3f]  ;;  %v190_v26 = vld [vmem:[%s139_s13 + $0x2] sm:$0xff] }
  0x16   : > { %v176_v15 = vadd.f32 %v175_v12, %v164_v11  ;;  %v177_v24 = vadd.f32 %v172_v20, %v161_v19  ;;  %v197_v30 = vsel %vm196_vm3, %v191_v25, %v195_v22 }
  0x18   : > { %v179_v23 = vadd.f32 %v176_v15, %v154_v4  ;;  %v180_v29 = vadd.f32 %v178_v21, %v177_v24 }
  0x1a   : > { %v188_v28 = vadd.f32 %v181_v18, %v179_v23  ;;  %v189_v32 = vadd.f32 %v187_v27, %v180_v29 }
  0x1c   : > { %v198_v31 = vadd.f32 %v190_v26, %v188_v28  ;;  %v199_v34 = vadd.f32 %v197_v30, %v189_v32 }
  0x1e   : > { %v200_v33 = vmul.f32 0.2, %v198_v31  ;;  %v201_v35 = vmul.f32 0.2, %v199_v34 }
  0x20   : > { %203 = vst.msk [vmem:[%s147_s16] sm:$0xff] %vm202_vm4, %v200_v33  ;;  %204 = vst.msk [vmem:[%s147_s16 + $0x8] sm:$0xff] %vm202_vm4, %v201_v35 }
  0x21 PF: > { %s11_s8 = sadd.s32 1, %s347_s8   ;;  %s405_s6 = smov %s343_s7 }
  0x22   : > { %p8_p5 = scmp.ge.s32.totalorder %s11_s8, 4   ;;  %s406_s7 = smov %s408_s9 }
  0x24   :  { %10 = sbr.rel (!%p8_p5) target bundleno = 2 (0x2), region = 54 }

</bundles_post_ra>
